<compile_context>
chip_gen: v7x
topology: tpu7x:2x2x1
jax: 0.10.0
libtpu: 0.0.40
codegen_flags: <defaults>
</compile_context>

<pallas_src>
import functools

import jax
import jax.numpy as jnp
from jax.experimental import pallas as pl
from jax.experimental.pallas import tpu as pltpu


def _layer_norm_kernel(x_ref, scale_ref, shift_ref, o_ref, *, eps):
    # x_ref: (tile_rows, embed_dim); scale/shift: (1, embed_dim)
    # Pass 1: mean (row reduction -> XLU; has slack under the DMA bound).
    mean = jnp.mean(x_ref[...].astype(jnp.float32), axis=-1, keepdims=True)
    # Pass 2: population variance, re-reading x from VMEM so only one
    # full-tile f32 temporary is live at a time.
    centered = x_ref[...].astype(jnp.float32) - mean
    var = jnp.mean(centered * centered, axis=-1, keepdims=True)
    inv_std = jax.lax.rsqrt(var + eps)
    # Pass 3: fused normalize + affine, single streamed write.
    o_ref[...] = (
        (x_ref[...].astype(jnp.float32) - mean) * inv_std
        * scale_ref[...].astype(jnp.float32)
        + shift_ref[...].astype(jnp.float32)
    ).astype(o_ref.dtype)


def _cdiv(a, b):
    return -(-a // b)


def _round_up(x, m):
    return ((x + m - 1) // m) * m


def _vmem_capacity_bytes():
    """Physical VMEM per TensorCore; conservative 64 MiB fallback (v7x)."""
    try:
        info = pltpu.get_tpu_info()
        cap = getattr(info, "vmem_capacity_bytes", None)
        if cap:
            return int(cap)
    except Exception:
        pass
    return 64 * 2**20


def _vmem_budgets():
    """(block_budget_bytes, vmem_limit_cap_bytes), generation-aware."""
    cap = _vmem_capacity_bytes()
    if cap >= 128 * 2**20:
        # v5e / v6e: 128 MiB VMEM per TensorCore -> spend it on bigger tiles.
        return 64 * 2**20, 100 * 2**20
    # v7x: 64 MiB VMEM per TensorCore -> stay conservative.
    return 24 * 2**20, 56 * 2**20


def layer_norm(x, scale, shift, *, eps=1e-5, row_tile=None):
    """LayerNorm over the last axis of x. x: (..., embed_dim)."""
    orig_shape = x.shape
    embed_dim = orig_shape[-1]
    rows = 1
    for d in orig_shape[:-1]:
        rows *= d

    x2 = x.reshape(rows, embed_dim)
    scale2 = scale.reshape(1, embed_dim)
    shift2 = shift.reshape(1, embed_dim)

    itemsize = jnp.dtype(x.dtype).itemsize
    sublane = max(8, 32 // max(itemsize, 1))  # 8 f32 / 16 bf16 / 32 int8 rows

    # VMEM bytes per tile row: double-buffered in+out blocks (pipeline) plus
    # ~2 live full-tile f32 temporaries inside the kernel body.
    per_row_bytes = embed_dim * (4 * itemsize + 2 * 4)
    block_budget, vmem_cap = _vmem_budgets()
    budget_tile = max(sublane, (block_budget // per_row_bytes) // sublane * sublane)

    if row_tile is not None:
        tile = _round_up(max(int(row_tile), 1), sublane)
    else:
        # Keep >= ~4 grid steps when rows allows it (megacore sharding on v7x
        # plus pipeline overlap), capped at 1024 rows (HBM roofline plateau).
        tile = _round_up(max(1, _cdiv(rows, 4)), sublane)
        tile = min(tile, 1024)
    # Budget check applies to both paths (including explicit row_tile).
    tile = max(sublane, min(tile, budget_tile))

    num_tiles = _cdiv(rows, tile)

    # Explicit VMEM budget: pipelined blocks + f32 temps + params, ~25% headroom.
    block_bytes = tile * per_row_bytes
    param_bytes = 2 * 2 * embed_dim * max(4, jnp.dtype(scale.dtype).itemsize)
    vmem_limit = int(min(vmem_cap,
                         max(32 * 2**20, block_bytes * 5 // 4 + param_bytes)))

    # TODO(synk): for embed_dim % 128 != 0 (e.g. D=32), fold rows into lanes to
    # present a lane-dense slab and avoid masked vst.msk partial stores.
    # TODO(synk): on v7x with wide embed_dim (small forced tiles), sweep
    # pipeline_mode=pl.Buffered(3) on the x/out BlockSpecs.

    kernel = functools.partial(_layer_norm_kernel, eps=eps)

    out2 = pl.pallas_call(
        kernel,
        out_shape=jax.ShapeDtypeStruct((rows, embed_dim), x.dtype),
        grid_spec=pltpu.PrefetchScalarGridSpec(
            num_scalar_prefetch=0,
            grid=(num_tiles,),
            in_specs=[
                pl.BlockSpec((tile, embed_dim), lambda i: (i, 0)),
                pl.BlockSpec((1, embed_dim), lambda i: (0, 0)),
                pl.BlockSpec((1, embed_dim), lambda i: (0, 0)),
            ],
            out_specs=pl.BlockSpec((tile, embed_dim), lambda i: (i, 0)),
        ),
        compiler_params=pltpu.CompilerParams(
            dimension_semantics=("parallel",),
            vmem_limit_bytes=vmem_limit,
        ),
        cost_estimate=pl.CostEstimate(
            flops=8 * rows * embed_dim,
            transcendentals=rows,
            bytes_accessed=2 * rows * embed_dim * itemsize + 2 * embed_dim * 4,
        ),
    )(x2, scale2, shift2)

    return out2.reshape(orig_shape)


def layer_norm_ref(x, scale, shift, eps=1e-5):
    """Pure-JAX reference matching the PyTorch module."""
    xf = x.astype(jnp.float32)
    mean = jnp.mean(xf, axis=-1, keepdims=True)
    var = jnp.mean((xf - mean) ** 2, axis=-1, keepdims=True)
    norm = (xf - mean) / jnp.sqrt(var + eps)
    return (scale.astype(jnp.float32) * norm + shift.astype(jnp.float32)).astype(x.dtype)


if __name__ == "__main__":
    key = jax.random.PRNGKey(0)
    k0, k1 = jax.random.split(key)

    # Case 1: (batch, seq, embed_dim) f32; rows=18 exercises the ragged final
    # block (grid of 8-row tiles, last block only partially valid).
    batch, seq, embed_dim = 2, 9, 32
    x = jax.random.normal(k0, (batch, seq, embed_dim), dtype=jnp.float32)
    scale = jnp.ones((embed_dim,), dtype=jnp.float32)   # nn.Parameter(torch.ones)
    shift = jnp.zeros((embed_dim,), dtype=jnp.float32)  # nn.Parameter(torch.zeros)

    out = jax.block_until_ready(layer_norm(x, scale, shift, eps=1e-5))
    ref = layer_norm_ref(x, scale, shift, eps=1e-5)
    assert out.shape == x.shape
    assert jnp.allclose(out, ref, atol=1e-5, rtol=1e-5), "f32 mismatch vs reference"

    # Case 2: bf16 I/O, rows=15 (< one 16-row bf16 tile) -> single ragged block.
    b2, s2, d2 = 3, 5, 128
    x_bf16 = jax.random.normal(k1, (b2, s2, d2), dtype=jnp.float32).astype(jnp.bfloat16)
    scale2 = jnp.ones((d2,), dtype=jnp.float32)
    shift2 = jnp.zeros((d2,), dtype=jnp.float32)

    out2 = jax.block_until_ready(layer_norm(x_bf16, scale2, shift2, eps=1e-5))
    ref2 = layer_norm_ref(x_bf16, scale2, shift2, eps=1e-5)
    assert out2.shape == x_bf16.shape
    assert jnp.allclose(out2.astype(jnp.float32), ref2.astype(jnp.float32),
                        atol=2e-2, rtol=2e-2), "bf16 mismatch vs reference"

    print("KERNEL_OK")
</pallas_src>

<mosaic_0001>
module attributes {stable_mosaic.version = 11 : i64} {
  func.func @_layer_norm_kernel(%arg0: i32, %arg1: memref<8x32xf32, #tpu.memory_space<vmem>>, %arg2: memref<1x32xf32, #tpu.memory_space<vmem>>, %arg3: memref<1x32xf32, #tpu.memory_space<vmem>>, %arg4: memref<8x32xf32, #tpu.memory_space<vmem>>) attributes {dimension_semantics = [#tpu.dimension_semantics<parallel>], iteration_bounds = array<i64: 3>, scalar_prefetch = 0 : i64, scratch_operands = 0 : i64, tpu.core_type = #tpu.core_type<tc>, window_params = [{transform_indices = @transform_0, window_bounds = array<i64: 8, 32>}, {pipeline_mode = #tpu.pipeline_mode<synchronous>, transform_indices = @transform_1, window_bounds = array<i64: 1, 32>}, {pipeline_mode = #tpu.pipeline_mode<synchronous>, transform_indices = @transform_2, window_bounds = array<i64: 1, 32>}, {transform_indices = @transform_3, window_bounds = array<i64: 8, 32>}]} {
    %c0 = arith.constant 0 : index
    %c0_0 = arith.constant 0 : index
    %0 = vector.load %arg1[%c0, %c0_0] : memref<8x32xf32, #tpu.memory_space<vmem>>, vector<8x32xf32>
    %cst = arith.constant dense<0.000000e+00> : vector<8xf32>
    %1 = vector.multi_reduction <add>, %0, %cst [1] : vector<8x32xf32> to vector<8xf32>
    %2 = vector.shape_cast %1 : vector<8xf32> to vector<8x1xf32>
    %cst_1 = arith.constant 3.200000e+01 : f32
    %3 = vector.broadcast %cst_1 : f32 to vector<8x1xf32>
    %4 = arith.divf %2, %3 : vector<8x1xf32>
    %c0_2 = arith.constant 0 : index
    %c0_3 = arith.constant 0 : index
    %5 = vector.load %arg1[%c0_2, %c0_3] : memref<8x32xf32, #tpu.memory_space<vmem>>, vector<8x32xf32>
    %6 = vector.broadcast %4 : vector<8x1xf32> to vector<8x32xf32>
    %7 = arith.subf %5, %6 : vector<8x32xf32>
    %8 = arith.mulf %7, %7 : vector<8x32xf32>
    %cst_4 = arith.constant dense<0.000000e+00> : vector<8xf32>
    %9 = vector.multi_reduction <add>, %8, %cst_4 [1] : vector<8x32xf32> to vector<8xf32>
    %10 = vector.shape_cast %9 : vector<8xf32> to vector<8x1xf32>
    %cst_5 = arith.constant 3.200000e+01 : f32
    %11 = vector.broadcast %cst_5 : f32 to vector<8x1xf32>
    %12 = arith.divf %10, %11 : vector<8x1xf32>
    %cst_6 = arith.constant 9.99999974E-6 : f32
    %13 = vector.broadcast %cst_6 : f32 to vector<8x1xf32>
    %14 = arith.addf %12, %13 : vector<8x1xf32>
    %15 = math.rsqrt %14 : vector<8x1xf32>
    %c0_7 = arith.constant 0 : index
    %c0_8 = arith.constant 0 : index
    %16 = vector.load %arg1[%c0_7, %c0_8] : memref<8x32xf32, #tpu.memory_space<vmem>>, vector<8x32xf32>
    %17 = vector.broadcast %4 : vector<8x1xf32> to vector<8x32xf32>
    %18 = arith.subf %16, %17 : vector<8x32xf32>
    %19 = vector.broadcast %15 : vector<8x1xf32> to vector<8x32xf32>
    %20 = arith.mulf %18, %19 : vector<8x32xf32>
    %c0_9 = arith.constant 0 : index
    %c0_10 = arith.constant 0 : index
    %21 = vector.load %arg2[%c0_9, %c0_10] : memref<1x32xf32, #tpu.memory_space<vmem>>, vector<1x32xf32>
    %22 = vector.broadcast %21 : vector<1x32xf32> to vector<8x32xf32>
    %23 = arith.mulf %20, %22 : vector<8x32xf32>
    %c0_11 = arith.constant 0 : index
    %c0_12 = arith.constant 0 : index
    %24 = vector.load %arg3[%c0_11, %c0_12] : memref<1x32xf32, #tpu.memory_space<vmem>>, vector<1x32xf32>
    %25 = vector.broadcast %24 : vector<1x32xf32> to vector<8x32xf32>
    %26 = arith.addf %23, %25 : vector<8x32xf32>
    %c0_13 = arith.constant 0 : index
    %c0_14 = arith.constant 0 : index
    %27 = vector.load %arg4[%c0_13, %c0_14] : memref<8x32xf32, #tpu.memory_space<vmem>>, vector<8x32xf32>
    tpu.vector_store %arg4[%c0_13, %c0_14], %26 {strides = array<i32>} : memref<8x32xf32, #tpu.memory_space<vmem>>, vector<8x32xf32>,
    return
  }
  func.func @transform_0(%arg0: i32) -> (i32, i32) {
    %c0_i32 = arith.constant 0 : i32
    %c0_i32_0 = arith.constant 0 : i32
    return %arg0, %c0_i32 : i32, i32
  }
  func.func @transform_1(%arg0: i32) -> (i32, i32) {
    %c0_i32 = arith.constant 0 : i32
    %c0_i32_0 = arith.constant 0 : i32
    %c0_i32_1 = arith.constant 0 : i32
    return %c0_i32, %c0_i32_0 : i32, i32
  }
  func.func @transform_2(%arg0: i32) -> (i32, i32) {
    %c0_i32 = arith.constant 0 : i32
    %c0_i32_0 = arith.constant 0 : i32
    %c0_i32_1 = arith.constant 0 : i32
    return %c0_i32, %c0_i32_0 : i32, i32
  }
  func.func @transform_3(%arg0: i32) -> (i32, i32) {
    %c0_i32 = arith.constant 0 : i32
    %c0_i32_0 = arith.constant 0 : i32
    return %arg0, %c0_i32 : i32, i32
  }
}

</mosaic_0001>

<bundles_post_ra>
// kernel: tpu_custom_call.1
= control target key start
LH: loop header
LB: loop body
LE: loop exit
PB: predicated region body
PF: predicated region fallthrough
CT: control target
= control target key end

     0   :  { %8 = vsyncpa [#allocation3], 0  ;;  %s653_s0 = inlined_call_operand.hbm [shape: f32[18,32], index: 0, kind: input, shape index: {}]   ;;  %s654_s1 = inlined_call_operand.vmem [shape: f32[1,32], index: 1, kind: input, shape index: {}]   ;;  %s655_s2 = inlined_call_operand.vmem [shape: f32[1,32], index: 2, kind: input, shape index: {}]   ;;  %s656_s3 = inlined_call_operand.hbm [shape: f32[18,32], index: 3, kind: output, shape index: {}]  }
   0x1   :  { %10 = vsyncpa [#allocation3 + $0x1], 0 }
   0x2   :  { %11 = vsyncpa [#allocation4], 0 }
   0x3   :  { %13 = vsyncpa [#allocation4 + $0x1], 0  ;;  %s485_s12 = smov 0   ;;  %s487_s13 = smov 0  }
   0x4   :  { %s489_s14 = smov 0   ;;  %s491_s15 = smov 0  }
   0x5 LB: > { %s506_s16 = sadd.s32 4294967295, %s461_s15   ;;  %s303_s17 = sadd.s32 4294967294, %s461_s15   ;;  %s461_s15 = sphi %s491_s15, %s670_s15   ;;  %s457_s14 = sphi %s489_s14, %s669_s14   ;;  %s453_s13 = sphi %s487_s13, %s668_s13   ;;  %s449_s12 = sphi %s485_s12, %s667_s12  }
   0x6   : > { %s510_s18 = sadd.s32 1, %s461_s15   ;;  %s26_s19 = sadd.s32 1, %s457_s14 }
   0x7   : > { %s23_s20 = ssub.s32 %s461_s15, %s510_s18  ;;  %p33_p0 = scmp.ne.s32.totalorder %s457_s14, %s453_s13 }
   0x8   : > { %p24_p1 = scmp.eq.s32.totalorder %s23_s20, 0  ;;  %p34_p2 = scmp.eq.s32.totalorder %s461_s15, 0 }
   0x9   : > { %p39_p3 = scmp.ne.s32.totalorder %s453_s13, %s449_s12  ;;  %p40_p4 = scmp.eq.s32.totalorder %s506_s16, 0 }
   0xa   : > { %s522_s21 = scalar_select %p24_p1, %s457_s14, %s26_s19  }
   0xb   : > { %p524_p5 = por %p34_p2, %p33_p0  ;;  %p528_p6 = por %p40_p4, %p39_p3 }
   0xc   : > { %p105_p7 = scmp.eq.s32.totalorder %s506_s16, 2  ;;  %p111_p8 = scmp.eq.s32.totalorder %s303_s17, 2 }
   0xd   : > { %p329_p9 = scmp.lt.s32.totalorder %s461_s15, 3  ;;  %s137_s26 = sand.u32 1, %s457_s14  }
   0xe   : > { %p534_p10 = por %p105_p7, %p33_p0  ;;  %p538_p11 = por %p111_p8, %p39_p3 }
   0xf   : > { %s307_s27 = sshll.u32 %s461_s15, 7  ;;  %s306_s28 = sshll.u32 %s137_s26, 3 }
  0x10   : > { %s660_s24 = scalar_select %p534_p10, 1, 0 }
  0x11   : > { %s661_s25 = scalar_select %p538_p11, 1, 0 }
  0x12   : > { %s547_s4 = scalar_lea.hbm %s653_s0, %s307_s27  ;;  %s141_s5 = scalar_lea.vmem [#allocation2], %s306_s28 }
  0x13   : > { %s148_s6 = sshll.u32 %s141_s5, 4  ;;  %p551_p12 = pnand %p329_p9, %p524_p5  ;;  %s555_s6 = int_to_ptr.vmem [resolvable:$true] %s148_s6 }
  0x14   : > { %s138_s8 = scalar_lea.sflag [#allocation3], %s137_s26  ;;  %s365_s9 = scalar_lea.hbm %s547_s4, 128 }
  0x15   : > { %p366_p1 = scmp.ne.s32.totalorder %s547_s4, %s365_s9  ;;  %p367_p2 = pneg %p551_p12 }
  0x16   : > { %s370_s17 = scalar_lea.hbm %s653_s0, 384  ;;  %p371_p5 = scmp.lt.u32.totalorder %s547_s4, %s653_s0 }
  0x17   : > { %p368_p3 = pnand %p367_p2, %p366_p1  ;;  %p372_p7 = scmp.lt.u32.totalorder %s370_s17, %s365_s9 }
  0x18   : > { %p374_p9 = scmp.lt.u32.totalorder %s365_s9, %s547_s4 }
  0x19   : > { %p369_p4 = pneg %p368_p3  ;;  %p373_p8 = por %p372_p7, %p371_p5 }
  0x1b   : > { %p375_p13 = por %p374_p9, %p373_p8 }
  0x1d   : > { %p376_p0 = pnand %p375_p13, %p369_p4 }
  0x1f   : > { %379 = shalt.err (!%p376_p0)
}
  0x20   : > { %s380_s22 = scalar_lea.vmem %s555_s6, 128  ;;  %s463_s26 = smov [#allocation2]  }
  0x21   : > { %p381_p1 = scmp.ne.s32.totalorder %s555_s6, %s380_s22  ;;  %s385_s27 = sshll.u32 %s463_s26, 4  ;;  %s386_s27 = int_to_ptr.vmem [resolvable:$false] %s385_s27 }
  0x22   : > { %s387_s28 = scalar_lea.vmem %s386_s27, 256  ;;  %p388_p10 = scmp.lt.s32.totalorder %s555_s6, %s386_s27 }
  0x23   : > { %p383_p3 = pnand %p381_p1, %p367_p2  ;;  %p389_p5 = scmp.lt.s32.totalorder %s387_s28, %s380_s22 }
  0x25   : > { %p384_p11 = pneg %p383_p3  ;;  %p390_p7 = por %p389_p5, %p388_p10 }
  0x27   : > { %p391_p8 = pnand %p390_p7, %p384_p11 }
  0x29   : > { %394 = shalt.err (!%p391_p8)
}
  0x2a   : > { %324 = dma.hbm_to_vmem [thread:$0]  (!%p551_p12), %s547_s4, 128, %s555_s6, %s138_s8  }
  0x2b   : > { %p663_p13 = scmp.lt.s32.totalorder %s461_s15, 4  ;;  %p664_p0 = scmp.ge.s32.totalorder %s461_s15, 1 }
  0x2d   : > { %p154_p2 = pnand %p664_p0, %p663_p13 }
  0x2e   : > { %s589_s29 = sand.u32 (!%p154_p2), 1, %s453_s13  }
  0x2f   : > { %157 = sbr.rel (%p154_p2) target bundleno = 383 (0x17f), region = 32  ;;  %s309_s30 = sshll.u32 (!%p154_p2), %s589_s29, 3 }
  0x30   : > { %s160_s5 = scalar_lea.sflag (!%p154_p2), [#allocation3], %s589_s29  ;;  %s163_s9 = scalar_lea.vmem (!%p154_p2), [#allocation2], %s309_s30 }
  0x36   : > { %440 = dma.done.wait (%p528_p6), %s160_s5, 128  }
  0x37   : > { %442 = vsyncadd (%p528_p6), %s160_s5, 4294967168  ;;  %vm187_vm0 = vcmask 261120   ;;  %v186_v0 = vld [vmem:[%s163_s9] sm:$0xff]  ;;  %s314_s8 = sshll.u32 %s506_s16, 7  ;;  %s185_s10 = scalar_lea.vmem [#allocation5], %s309_s30 }
  0x38   : > { %v188_v1 = vsel %vm187_vm0, %v186_v0, 0.0  ;;  %v311_v11 = vld [vmem:[%s654_s1] ss:$0 sm:$0xff]  ;;  %s233_s11 = sshll.u32 %s185_s10, 4  ;;  %s609_s20 = scalar_lea.hbm %s656_s3, %s314_s8  ;;  %s611_s11 = int_to_ptr.vmem [resolvable:$true] %s233_s11 }
  0x39   : > { %189 = vadd.xlane.f32.xlu0 %v188_v1  ;;  %v312_v13 = vld [vmem:[%s655_s2] ss:$0 sm:$0xff]  ;;  %s220_s22 = scalar_lea.sflag [#allocation4], %s589_s29  ;;  %s395_s26 = scalar_lea.vmem %s611_s11, 128 }
  0x3a   : > { %p396_p6 = scmp.ne.s32.totalorder %s611_s11, %s395_s26  ;;  %p665_p10 = scmp.ne.s32.totalorder %s660_s24, 0 }
  0x3b   : > { %s464_s16 = smov [#allocation5]  }
  0x3c   : > { %p397_p11 = pnand %p396_p6, %p665_p10  ;;  %s399_s27 = sshll.u32 %s464_s16, 4  ;;  %s400_s27 = int_to_ptr.vmem [resolvable:$false] %s399_s27 }
  0x3d   : > { %s401_s28 = scalar_lea.vmem %s400_s27, 256  ;;  %p402_p4 = scmp.lt.s32.totalorder %s611_s11, %s400_s27 }
  0x3e   : > { %p398_p12 = pneg %p397_p11  ;;  %p403_p9 = scmp.lt.s32.totalorder %s401_s28, %s395_s26 }
  0x40   : > { %p404_p1 = por %p403_p9, %p402_p4 }
  0x42   : > { %p405_p3 = pnand %p404_p1, %p398_p12 }
  0xc6   : > { %v190_v2 = vpop.xlane.xlu0 %189 }
  0xc7   : > { %v192_v3 = vmul.f32 0.03125, %v190_v2 }
  0xc9   : > { %v193_v4 = vsub.f32 %v186_v0, %v192_v3 }
  0xcb   : > { %v194_v5 = vmul.f32 %v193_v4, %v193_v4 }
  0xcd   : > { %v195_v6 = vsel %vm187_vm0, %v194_v5, 0.0 }
  0xce   : > { %196 = vadd.xlane.f32.xlu0 %v195_v6 }
 0x15b   : > { %v197_v7 = vpop.xlane.xlu0 %196 }
 0x15c   : > { %v198_v8 = vmul.f32 0.03125, %v197_v7 }
 0x15e   : > { %v199_v9 = vadd.f32 1e-05, %v198_v8 }
 0x160   : > { %363 = vrsqrt.f32 %v199_v9 }
 0x16a   : > { %v364_v10 = vpop.eup %363 }
 0x16b   : > { %v201_v12 = vmul.f32 %v364_v10, %v193_v4 }
 0x16d   : > { %v209_v14 = vmul.f32 %v311_v11, %v201_v12 }
 0x16f   : > { %v217_v15 = vadd.f32 %v312_v13, %v209_v14 }
 0x171   : > { %218 = vst.msk [vmem:[%s185_s10] sm:$0xff] %vm187_vm0, %v217_v15 }
 0x172   : > { %408 = shalt.err (!%p405_p3)
}
 0x173   : > { %s409_s29 = scalar_lea.hbm %s609_s20, 128  ;;  %s413_s9 = scalar_lea.hbm %s656_s3, 384 }
 0x174   : > { %p410_p5 = scmp.ne.s32.totalorder %s609_s20, %s409_s29  ;;  %p414_p13 = scmp.lt.u32.totalorder %s609_s20, %s656_s3 }
 0x175   : > { %p415_p0 = scmp.lt.u32.totalorder %s413_s9, %s409_s29  ;;  %p417_p6 = scmp.lt.u32.totalorder %s409_s29, %s609_s20 }
 0x176   : > { %p411_p7 = pnand %p410_p5, %p665_p10 }
 0x177   : > { %p416_p2 = por %p415_p0, %p414_p13 }
 0x178   : > { %p412_p8 = pneg %p411_p7 }
 0x179   : > { %p418_p11 = por %p417_p6, %p416_p2 }
 0x17b   : > { %p419_p12 = pnand %p418_p11, %p412_p8 }
 0x17d   : > { %422 = shalt.err (!%p419_p12)
}
 0x17e   : > { %319 = dma.vmem_to_hbm [thread:$0]  (%p665_p10), %s611_s11, 128, %s609_s20, %s220_s22  }
 0x17f PF: > { %p330_p4 = scmp.ge.s32.totalorder %s461_s15, 2  ;;  %s245_s6 = sand.u32 1, %s449_s12  }
 0x180   : > { %p666_p9 = scmp.ne.s32.totalorder %s661_s25, 0  ;;  %s246_s7 = scalar_lea.sflag [#allocation4], %s245_s6 }
 0x182   : > { %p326_p1 = pnand %p330_p4, %p666_p9 }
 0x184   : > { %444 = dma.done.wait (!%p326_p1), %s246_s7, 128  }
 0x185   : > { %446 = vsyncadd (!%p326_p1), %s246_s7, 4294967168  ;;  %p16_p3 = scmp.ge.s32.totalorder %s510_s18, 5   ;;  %s667_s12 = smov %s453_s13 }
 0x186   : > { %s668_s13 = smov %s457_s14  ;;  %s669_s14 = smov %s522_s21 }
 0x187   : > { %s670_s15 = smov %s510_s18  ;;  %18 = sbr.rel (!%p16_p3) target bundleno = 5 (0x5), region = 77 }
 0x18e   :  { %251 = vsyncpa [#allocation3], 1 }
 0x18f   :  { %253 = vsyncpa [#allocation3 + $0x1], 1 }
 0x190   :  { %254 = vsyncpa [#allocation4], 1 }
 0x191   :  { %256 = vsyncpa [#allocation4 + $0x1], 1 }

</bundles_post_ra>
